<compile_context>
chip_gen: v7x
topology: tpu7x:2x2x1
jax: 0.10.0
libtpu: 0.0.40
codegen_flags: <defaults>
</compile_context>

<pallas_src>
import functools
import math

import jax
import jax.numpy as jnp
from jax.experimental import pallas as pl
from jax.experimental.pallas import tpu as pltpu


def _round_up(x, m):
    return ((x + m - 1) // m) * m


def _db_loss_kernel(x_ref, t_ref, bfinv_ref, vi_ref, out_ref, *,
                    rows_in_last, alpha, gamma, r_alpha, r_beta, beta_mu,
                    nt_lambda, eps, rk_bf16):
    """One (TN, Cp) row tile -> (1, 1, Cp) per-block partial loss sums."""
    x = x_ref[...].astype(jnp.float32)               # (TN, Cp) logits
    t = t_ref[...]
    if t.dtype != jnp.float32:
        t = t.astype(jnp.float32)
    pos = t > 0.0                                     # hard 0/1 targets
    bfinv = bfinv_ref[...].astype(jnp.float32)        # (1, Cp) r_beta / samples_per_cls (0 on pad lanes)
    vi = vi_ref[...].astype(jnp.float32)              # (1, Cp) class bias (+big on pad lanes)

    # --- negative-tolerant regularization, fused into one select ------------
    # ls = (t + (1-t)*lam) * (x - v_i);   s = where(t, ls, -ls) = where(t, os, -lam*os)
    os_in = x - vi
    s = jnp.where(pos, os_in, (-nt_lambda) * os_in)

    # --- focal/BCE in logit space (exact for hard 0/1 targets) ---------------
    # p_t = clip(sigmoid(s), eps, 1-eps);  bce = -log(p_t);  1 - p_t = e / (1 + e)
    e = jnp.exp(jnp.minimum(-s, -math.log(eps)))      # clamp == the eps lower clip
    bce = jnp.log1p(e)
    one_m_pt = e * pl.reciprocal(1.0 + e, approx=True)

    if gamma == 0.0:
        mod = None
    elif float(gamma).is_integer() and 0.0 < gamma <= 4.0:
        mod = one_m_pt                                 # repeated multiply: no exp/log
        for _ in range(int(gamma) - 1):
            mod = mod * one_m_pt
    else:
        mod = jnp.exp(gamma * jnp.log(one_m_pt))

    # --- alpha_factor * nt_weight folded into one constant select ------------
    if alpha < 0:
        w_pos, w_neg = 1.0, 1.0 / nt_lambda
    else:
        w_pos, w_neg = alpha, (1.0 - alpha) / nt_lambda
    w_t = jnp.where(pos, jnp.float32(w_pos), jnp.float32(w_neg))

    # --- rebalanced weighting -------------------------------------------------
    # r_k = sigmoid(r_beta*freq_inv/repeat_rate - r_beta*r_mu) + r_alpha
    rr_scaled = jnp.sum(jnp.where(pos, bfinv, 0.0), axis=-1, keepdims=True)  # (TN,1) = r_beta*repeat_rate
    inv_rr = r_beta / jnp.maximum(rr_scaled, 1e-30)    # guard rows with no positives
    arg = bfinv * inv_rr - beta_mu                     # (TN, Cp)
    if rk_bf16:
        # opt-in v6e/v7x EUP bf16 path (do not use on v5e); slightly perturbs r_k
        r_k = jax.nn.sigmoid(arg.astype(jnp.bfloat16)).astype(jnp.float32) + r_alpha
    else:
        r_k = jax.nn.sigmoid(arg) + r_alpha

    focal = (mod * bce) if mod is not None else bce
    loss = (r_k * w_t) * focal                         # (TN, Cp); padded lanes are exactly 0

    # --- lane-dense per-block partial sums; row mask only on the last block ---
    if rows_in_last is None:
        out_ref[0] = jnp.sum(loss, axis=0, keepdims=True)
    else:
        last = pl.num_programs(0) - 1

        @pl.when(pl.program_id(0) == last)
        def _():
            out_ref[0] = jnp.sum(loss[:rows_in_last, :], axis=0, keepdims=True)

        @pl.when(pl.program_id(0) != last)
        def _():
            out_ref[0] = jnp.sum(loss, axis=0, keepdims=True)


def distribution_balanced_loss(logits, target, samples_per_cls, v_i=None, *,
                               alpha=0.25, gamma=2.0,
                               rebalance_alpha=0.1, rebalance_beta=10.0,
                               rebalance_mu=0.2, nt_lambda=2.0,
                               reduction="none", eps=1e-8,
                               block_rows=None, rk_sigmoid_bf16=False):
    """JAX/Pallas equivalent of DistributionBalancedLoss.forward (loss_function='focal_loss')."""
    assert logits.ndim == 2
    N, C = logits.shape
    assert target.shape == (N, C)
    assert float(nt_lambda) > 0.0

    if target.dtype == jnp.bool_:
        target = target.astype(jnp.int8)

    spc = jnp.asarray(samples_per_cls, jnp.float32).reshape(1, C)
    beta_finv = float(rebalance_beta) / spc            # r_beta folded into the class vector
    vi = (jnp.zeros((1, C), jnp.float32) if v_i is None
          else jnp.asarray(v_i, jnp.float32).reshape(1, C))

    # ---- lane-pad classes to a multiple of 128.  Padded lanes: beta_finv = 0 and a
    # large positive v_i, which drives the padded-lane loss to exactly 0 in-kernel
    # (no per-element column masking needed).
    c_pad = _round_up(C, 128)
    if c_pad != C:
        pc = ((0, 0), (0, c_pad - C))
        logits = jnp.pad(logits, pc)
        target = jnp.pad(target, pc)
        beta_finv = jnp.pad(beta_finv, pc)
        vi = jnp.pad(vi, pc, constant_values=100.0 / min(float(nt_lambda), 1.0))

    # ---- pick the batch tile from the device VMEM budget ---------------------
    itemsize_x = jnp.dtype(logits.dtype).itemsize
    itemsize_t = jnp.dtype(target.dtype).itemsize
    row_align = max(32 // itemsize_x, 32 // itemsize_t, 8)   # packed-sublane alignment

    try:
        vmem_cap = int(pltpu.get_tpu_info().vmem_capacity_bytes)  # 64 MiB v7x, 128 MiB v5e/v6e
    except Exception:
        vmem_cap = 64 * 1024 * 1024
    vmem_limit = max(min(vmem_cap - 16 * 1024 * 1024, 100 * 1024 * 1024),
                     32 * 1024 * 1024)

    if block_rows is None:
        # 2 pipeline buffers per streamed input + ~14 live full-tile f32 temporaries.
        budget = max(vmem_limit - 8 * 1024 * 1024, 16 * 1024 * 1024)
        per_row = c_pad * (2 * (itemsize_x + itemsize_t) + 14 * 4)
        tn = budget // per_row
        tn = min(tn, 512 if vmem_cap <= 64 * 1024 * 1024 else 1024)
    else:
        tn = int(block_rows)
    tn = min(int(tn), _round_up(N, row_align))          # never (much) taller than the batch
    if N > 2 * row_align:                                # keep >= 2 blocks for v7x's 2 TCs
        tn = min(tn, _round_up(pl.cdiv(N, 2), row_align))
    tn = max(row_align, (tn // row_align) * row_align)

    # If the aligned tile is taller than the batch (tiny N), pad rows once on the
    # host (cheap); otherwise rely on the cdiv grid + last-block static slice.
    if tn > N:
        pr = ((0, tn - N), (0, 0))
        logits = jnp.pad(logits, pr)
        target = jnp.pad(target, pr)

    num_blocks = pl.cdiv(N, tn)
    rows_in_last = None if num_blocks * tn == N else (N - (num_blocks - 1) * tn)

    # reductions are (total sum of loss elements) * scale:
    #   'mean' -> 1/(N*C), 'sum' -> 1, default 'none' -> mean(sum(loss,-1)) = 1/N
    if reduction == "mean":
        final_scale = 1.0 / (N * C)
    elif reduction == "sum":
        final_scale = 1.0
    else:
        final_scale = 1.0 / N

    kernel = functools.partial(
        _db_loss_kernel,
        rows_in_last=rows_in_last,
        alpha=float(alpha), gamma=float(gamma),
        r_alpha=float(rebalance_alpha), r_beta=float(rebalance_beta),
        beta_mu=float(rebalance_beta) * float(rebalance_mu),
        nt_lambda=float(nt_lambda), eps=float(eps),
        rk_bf16=bool(rk_sigmoid_bf16))

    partial_sums = pl.pallas_call(
        kernel,
        out_shape=jax.ShapeDtypeStruct((num_blocks, 1, c_pad), jnp.float32),
        grid_spec=pltpu.PrefetchScalarGridSpec(
            num_scalar_prefetch=0,
            grid=(num_blocks,),
            in_specs=[
                pl.BlockSpec((tn, c_pad), lambda i: (i, 0)),   # logits tile (native dtype)
                pl.BlockSpec((tn, c_pad), lambda i: (i, 0)),   # target tile (native dtype)
                pl.BlockSpec((1, c_pad), lambda i: (0, 0)),    # r_beta / samples_per_cls
                pl.BlockSpec((1, c_pad), lambda i: (0, 0)),    # v_i (+big on pad lanes)
            ],
            out_specs=pl.BlockSpec((1, 1, c_pad), lambda i: (i, 0, 0)),
        ),
        compiler_params=pltpu.CompilerParams(
            dimension_semantics=("parallel",),
            vmem_limit_bytes=int(vmem_limit)),
    )(logits, target, beta_finv, vi)

    return jnp.sum(partial_sums) * final_scale


# ----------------------- pure-JAX reference (for checking) -----------------------
def _db_loss_ref(logits, target, samples_per_cls, v_i=None, alpha=0.25, gamma=2.0,
                 r_alpha=0.1, r_beta=10.0, r_mu=0.2, nt_lambda=2.0,
                 reduction="none", eps=1e-8):
    C = logits.shape[-1]
    samples_per_cls = jnp.asarray(samples_per_cls, jnp.float32)
    vi = jnp.zeros((C,), jnp.float32) if v_i is None else jnp.asarray(v_i, jnp.float32)
    x = logits.astype(jnp.float32)
    t = target.astype(jnp.float32)

    os_input = x - vi
    ls_input = (t + (1 - t) * nt_lambda) * os_input
    p = jax.nn.sigmoid(ls_input)
    nt_w = t + (1 - t) * (1.0 / nt_lambda)

    freq_inv = 1.0 / samples_per_cls
    repeat_rate = jnp.sum(t * freq_inv, axis=1, keepdims=True)
    pos_weight = freq_inv[None, :] / repeat_rate
    r_k = jax.nn.sigmoid(r_beta * (pos_weight - r_mu)) + r_alpha

    p_c = jnp.clip(p, eps, 1.0 - eps)
    bce = -(t * jnp.maximum(jnp.log(p_c), -100.0)
            + (1 - t) * jnp.maximum(jnp.log(1.0 - p_c), -100.0))
    p_t = t * p_c + (1 - t) * (1 - p_c)
    alpha_factor = jnp.ones_like(t) if alpha < 0 else t * alpha + (1 - t) * (1 - alpha)
    modulating = jnp.power(1.0 - p_t, gamma)
    loss = r_k * nt_w * (alpha_factor * modulating * bce)

    if reduction == "mean":
        return jnp.mean(loss)
    if reduction == "sum":
        return jnp.sum(loss)
    return jnp.mean(jnp.sum(loss, axis=-1))


if __name__ == "__main__":
    key = jax.random.PRNGKey(0)
    k1, k2, k3, k4 = jax.random.split(key, 4)

    # small multi-label problem
    N, C = 8, 16
    logits = jax.random.normal(k1, (N, C), jnp.float32) * 2.0
    target = (jax.random.uniform(k2, (N, C)) < 0.3).astype(jnp.float32)
    target = target.at[:, 0].set(1.0)           # >= 1 positive per sample
    spc = jnp.arange(1, C + 1, dtype=jnp.float32) * 10.0

    for red in ("none", "mean", "sum"):
        out = jax.block_until_ready(
            distribution_balanced_loss(logits, target, spc, reduction=red))
        ref = _db_loss_ref(logits, target, spc, reduction=red)
        assert jnp.allclose(out, ref, rtol=5e-3, atol=1e-5), (red, out, ref)

    # narrow-dtype streaming path: native bf16 logits + int8 targets (cast in-kernel)
    out_nw = jax.block_until_ready(
        distribution_balanced_loss(logits.astype(jnp.bfloat16),
                                   target.astype(jnp.int8), spc, reduction="none"))
    ref_nw = _db_loss_ref(logits.astype(jnp.bfloat16).astype(jnp.float32),
                          target, spc, reduction="none")
    assert jnp.allclose(out_nw, ref_nw, rtol=5e-3, atol=1e-5), (out_nw, ref_nw)

    # multi-block grid + partial last tile + lane padding + explicit v_i
    N2, C2 = 100, 200
    logits2 = jax.random.normal(k3, (N2, C2), jnp.float32) * 2.0
    target2 = (jax.random.uniform(k4, (N2, C2)) < 0.2).astype(jnp.float32)
    target2 = target2.at[:, 0].set(1.0)
    spc2 = jnp.arange(1, C2 + 1, dtype=jnp.float32) * 3.0
    v_i2 = jnp.linspace(-0.5, 0.5, C2, dtype=jnp.float32)
    out2 = jax.block_until_ready(
        distribution_balanced_loss(logits2, target2, spc2, v_i=v_i2, reduction="mean"))
    ref2 = _db_loss_ref(logits2, target2, spc2, v_i=v_i2, reduction="mean")
    assert jnp.allclose(out2, ref2, rtol=5e-3, atol=1e-6), (out2, ref2)

    print("KERNEL_OK")
</pallas_src>

<mosaic_0001>
module attributes {stable_mosaic.version = 11 : i64} {
  func.func @_db_loss_kernel(%arg0: i32, %arg1: memref<8x128xf32, #tpu.memory_space<vmem>>, %arg2: memref<8x128xf32, #tpu.memory_space<vmem>>, %arg3: memref<1x128xf32, #tpu.memory_space<vmem>>, %arg4: memref<1x128xf32, #tpu.memory_space<vmem>>, %arg5: memref<1x1x128xf32, #tpu.memory_space<vmem>>) attributes {dimension_semantics = [#tpu.dimension_semantics<parallel>], iteration_bounds = array<i64: 1>, scalar_prefetch = 0 : i64, scratch_operands = 0 : i64, tpu.core_type = #tpu.core_type<tc>, window_params = [{transform_indices = @transform_0, window_bounds = array<i64: 8, 128>}, {transform_indices = @transform_1, window_bounds = array<i64: 8, 128>}, {pipeline_mode = #tpu.pipeline_mode<synchronous>, transform_indices = @transform_2, window_bounds = array<i64: 1, 128>}, {pipeline_mode = #tpu.pipeline_mode<synchronous>, transform_indices = @transform_3, window_bounds = array<i64: 1, 128>}, {transform_indices = @transform_4, window_bounds = array<i64: 1, 1, 128>}]} {
    %c0 = arith.constant 0 : index
    %c0_0 = arith.constant 0 : index
    %0 = vector.load %arg1[%c0, %c0_0] : memref<8x128xf32, #tpu.memory_space<vmem>>, vector<8x128xf32>
    %c0_1 = arith.constant 0 : index
    %c0_2 = arith.constant 0 : index
    %1 = vector.load %arg2[%c0_1, %c0_2] : memref<8x128xf32, #tpu.memory_space<vmem>>, vector<8x128xf32>
    %cst = arith.constant 0.000000e+00 : f32
    %2 = vector.broadcast %cst : f32 to vector<8x128xf32>
    %3 = arith.cmpf ogt, %1, %2 : vector<8x128xf32>
    %c0_3 = arith.constant 0 : index
    %c0_4 = arith.constant 0 : index
    %4 = vector.load %arg3[%c0_3, %c0_4] : memref<1x128xf32, #tpu.memory_space<vmem>>, vector<1x128xf32>
    %c0_5 = arith.constant 0 : index
    %c0_6 = arith.constant 0 : index
    %5 = vector.load %arg4[%c0_5, %c0_6] : memref<1x128xf32, #tpu.memory_space<vmem>>, vector<1x128xf32>
    %6 = vector.broadcast %5 : vector<1x128xf32> to vector<8x128xf32>
    %7 = arith.subf %0, %6 : vector<8x128xf32>
    %cst_7 = arith.constant -2.000000e+00 : f32
    %8 = vector.broadcast %cst_7 : f32 to vector<8x128xf32>
    %9 = arith.mulf %8, %7 : vector<8x128xf32>
    %10 = arith.select %3, %7, %9 : vector<8x128xi1>, vector<8x128xf32>
    %cst_8 = arith.constant 0.000000e+00 : f32
    %11 = vector.broadcast %cst_8 : f32 to vector<8x128xf32>
    %12 = arith.subf %11, %10 : vector<8x128xf32>
    %cst_9 = arith.constant 18.420681 : f32
    %13 = vector.broadcast %cst_9 : f32 to vector<8x128xf32>
    %14 = arith.minimumf %12, %13 : vector<8x128xf32>
    %15 = math.exp %14 : vector<8x128xf32>
    %16 = math.log1p %15 : vector<8x128xf32>
    %cst_10 = arith.constant 1.000000e+00 : f32
    %17 = vector.broadcast %cst_10 : f32 to vector<8x128xf32>
    %18 = arith.addf %17, %15 : vector<8x128xf32>
    %19 = tpu.reciprocal %18 {approx = true} : vector<8x128xf32> -> vector<8x128xf32>
    %20 = arith.mulf %15, %19 : vector<8x128xf32>
    %21 = arith.mulf %20, %20 : vector<8x128xf32>
    %cst_11 = arith.constant 2.500000e-01 : f32
    %cst_12 = arith.constant 3.750000e-01 : f32
    %22 = vector.broadcast %cst_11 : f32 to vector<8x128xf32>
    %23 = vector.broadcast %cst_12 : f32 to vector<8x128xf32>
    %24 = arith.select %3, %22, %23 : vector<8x128xi1>, vector<8x128xf32>
    %cst_13 = arith.constant 0.000000e+00 : f32
    %25 = vector.shape_cast %4 : vector<1x128xf32> to vector<1x128xf32>
    %26 = vector.broadcast %25 : vector<1x128xf32> to vector<8x128xf32>
    %27 = vector.broadcast %cst_13 : f32 to vector<8x128xf32>
    %28 = arith.select %3, %26, %27 : vector<8x128xi1>, vector<8x128xf32>
    %cst_14 = arith.constant dense<0.000000e+00> : vector<8xf32>
    %29 = vector.multi_reduction <add>, %28, %cst_14 [1] : vector<8x128xf32> to vector<8xf32>
    %30 = vector.shape_cast %29 : vector<8xf32> to vector<8x1xf32>
    %cst_15 = arith.constant 1.000000e-30 : f32
    %31 = vector.broadcast %cst_15 : f32 to vector<8x1xf32>
    %32 = arith.maximumf %30, %31 : vector<8x1xf32>
    %cst_16 = arith.constant 1.000000e+01 : f32
    %33 = vector.broadcast %cst_16 : f32 to vector<8x1xf32>
    %34 = arith.divf %33, %32 : vector<8x1xf32>
    %35 = vector.broadcast %4 : vector<1x128xf32> to vector<8x128xf32>
    %36 = vector.broadcast %34 : vector<8x1xf32> to vector<8x128xf32>
    %37 = arith.mulf %35, %36 : vector<8x128xf32>
    %cst_17 = arith.constant 2.000000e+00 : f32
    %38 = vector.broadcast %cst_17 : f32 to vector<8x128xf32>
    %39 = arith.subf %37, %38 : vector<8x128xf32>
    %40 = arith.negf %39 : vector<8x128xf32>
    %41 = math.exp %40 : vector<8x128xf32>
    %cst_18 = arith.constant 1.000000e+00 : f32
    %42 = vector.broadcast %cst_18 : f32 to vector<8x128xf32>
    %43 = arith.addf %42, %41 : vector<8x128xf32>
    %44 = arith.divf %42, %43 : vector<8x128xf32>
    %cst_19 = arith.constant 1.000000e-01 : f32
    %45 = vector.broadcast %cst_19 : f32 to vector<8x128xf32>
    %46 = arith.addf %44, %45 : vector<8x128xf32>
    %47 = arith.mulf %21, %16 : vector<8x128xf32>
    %48 = arith.mulf %46, %24 : vector<8x128xf32>
    %49 = arith.mulf %48, %47 : vector<8x128xf32>
    %cst_20 = arith.constant dense<0.000000e+00> : vector<128xf32>
    %50 = vector.multi_reduction <add>, %49, %cst_20 [0] : vector<8x128xf32> to vector<128xf32>
    %51 = vector.shape_cast %50 : vector<128xf32> to vector<1x128xf32>
    %c0_21 = arith.constant 0 : index
    %c0_22 = arith.constant 0 : index
    %c0_23 = arith.constant 0 : index
    %52 = vector.load %arg5[%c0_21, %c0_22, %c0_23] : memref<1x1x128xf32, #tpu.memory_space<vmem>>, vector<1x1x128xf32>
    %53 = vector.shape_cast %52 : vector<1x1x128xf32> to vector<1x128xf32>
    %54 = vector.shape_cast %51 : vector<1x128xf32> to vector<1x1x128xf32>
    tpu.vector_store %arg5[%c0_21, %c0_22, %c0_23], %54 {strides = array<i32>} : memref<1x1x128xf32, #tpu.memory_space<vmem>>, vector<1x1x128xf32>,
    return
  }
  func.func @transform_0(%arg0: i32) -> (i32, i32) {
    %c0_i32 = arith.constant 0 : i32
    %c0_i32_0 = arith.constant 0 : i32
    return %arg0, %c0_i32 : i32, i32
  }
  func.func @transform_1(%arg0: i32) -> (i32, i32) {
    %c0_i32 = arith.constant 0 : i32
    %c0_i32_0 = arith.constant 0 : i32
    return %arg0, %c0_i32 : i32, i32
  }
  func.func @transform_2(%arg0: i32) -> (i32, i32) {
    %c0_i32 = arith.constant 0 : i32
    %c0_i32_0 = arith.constant 0 : i32
    %c0_i32_1 = arith.constant 0 : i32
    return %c0_i32, %c0_i32_0 : i32, i32
  }
  func.func @transform_3(%arg0: i32) -> (i32, i32) {
    %c0_i32 = arith.constant 0 : i32
    %c0_i32_0 = arith.constant 0 : i32
    %c0_i32_1 = arith.constant 0 : i32
    return %c0_i32, %c0_i32_0 : i32, i32
  }
  func.func @transform_4(%arg0: i32) -> (i32, i32, i32) {
    %c0_i32 = arith.constant 0 : i32
    %c0_i32_0 = arith.constant 0 : i32
    %c0_i32_1 = arith.constant 0 : i32
    return %arg0, %c0_i32, %c0_i32_0 : i32, i32, i32
  }
}

</mosaic_0001>

<bundles_post_ra>
// kernel: tpu_custom_call.1
= control target key start
LH: loop header
LB: loop body
LE: loop exit
PB: predicated region body
PF: predicated region fallthrough
CT: control target
= control target key end

     0   :  { %9 = vsyncpa [#allocation3], 0  ;;  %s287_s0 = inlined_call_operand.hbm [shape: f32[8,128], index: 0, kind: input, shape index: {}]   ;;  %s288_s1 = inlined_call_operand.hbm [shape: f32[8,128], index: 1, kind: input, shape index: {}]   ;;  %s289_s2 = inlined_call_operand.vmem [shape: f32[1,128], index: 2, kind: input, shape index: {}]   ;;  %s290_s3 = inlined_call_operand.vmem [shape: f32[1,128], index: 3, kind: input, shape index: {}]   ;;  %s291_s4 = inlined_call_operand.hbm [shape: f32[1,1,128], index: 4, kind: output, shape index: {}]  }
   0x1   :  { %10 = vsyncpa [#allocation6], 0 }
   0x2   :  { %11 = vsyncpa [#allocation4], 0  ;;  %s213_s15 = smov [#allocation2]   ;;  %s214_s17 = smov [#allocation5]  }
   0x3   :  { %s18_s16 = sshll.u32 %s213_s15, 4  ;;  %s28_s18 = sshll.u32 %s214_s17, 4  ;;  %s19_s16 = int_to_ptr.vmem [resolvable:$true] %s18_s16  ;;  %s29_s18 = int_to_ptr.vmem [resolvable:$true] %s28_s18 }
   0x4   :  { %s141_s21 = scalar_lea.hbm %s287_s0, 128 }
   0x5   :  { %p142_p0 = scmp.ne.s32.totalorder %s287_s0, %s141_s21  ;;  %p145_p1 = scmp.lt.u32.totalorder %s141_s21, %s287_s0 }
   0x7   :  { %p147_p2 = pnand %p145_p1, %p142_p0 }
   0x9   :  { %150 = shalt.err (!%p147_p2)
}
   0xa   :  { %s151_s26 = scalar_lea.vmem %s19_s16, 128  ;;  %p156_p4 = scmp.lt.s32.totalorder %s19_s16, %s19_s16 }
   0xb   :  { %p152_p3 = scmp.ne.s32.totalorder %s19_s16, %s151_s26  ;;  %p157_p5 = scmp.lt.s32.totalorder %s151_s26, %s151_s26 }
   0xd   :  { %p158_p6 = por %p157_p5, %p156_p4 }
   0xf   :  { %p159_p7 = pnand %p158_p6, %p152_p3 }
  0x11   :  { %162 = shalt.err (!%p159_p7)
}
  0x12   :  { %21 = dma.hbm_to_vmem [thread:$0]  %s287_s0, 128, %s19_s16, [#allocation3]  }
  0x13   :  { %s163_s5 = scalar_lea.hbm %s288_s1, 128 }
  0x14   :  { %p164_p8 = scmp.ne.s32.totalorder %s288_s1, %s163_s5  ;;  %p167_p9 = scmp.lt.u32.totalorder %s163_s5, %s288_s1 }
  0x16   :  { %p169_p10 = pnand %p167_p9, %p164_p8 }
  0x18   :  { %172 = shalt.err (!%p169_p10)
}
  0x19   :  { %s173_s10 = scalar_lea.vmem %s29_s18, 128  ;;  %p178_p12 = scmp.lt.s32.totalorder %s29_s18, %s29_s18 }
  0x1a   :  { %p174_p11 = scmp.ne.s32.totalorder %s29_s18, %s173_s10  ;;  %p179_p13 = scmp.lt.s32.totalorder %s173_s10, %s173_s10 }
  0x1c   :  { %p180_p0 = por %p179_p13, %p178_p12 }
  0x1e   :  { %p181_p1 = pnand %p180_p0, %p174_p11 }
  0x20   :  { %184 = shalt.err (!%p181_p1)
}
  0x21   :  { %31 = dma.hbm_to_vmem [thread:$0]  %s288_s1, 128, %s29_s18, [#allocation6]  }
  0x22   :  { %207 = dma.done.wait [#allocation3], 128  }
  0x23   :  { %208 = vsyncadd [#allocation3], 4294967168 }
  0x24   :  { %209 = dma.done.wait [#allocation6], 128  }
  0x25   :  { %210 = vsyncadd [#allocation6], 4294967168  ;;  %v43_v0 = vld [vmem:[#allocation5] sm:$0xff]  ;;  %v122_v1 = vld [vmem:[%s289_s2] ss:$0 sm:$0xff]  ;;  %v215_v33 = vmov 0.375  }
  0x26   :  { %vm44_vm0 = vcmp.gt.f32.partialorder %v43_v0, 0.0  ;;  %v42_v3 = vld [vmem:[#allocation2] sm:$0xff]  ;;  %s216_s1 = smov [#allocation7]  }
  0x27   :  { %v80_v2 = vsel %vm44_vm0, %v122_v1, 0.0  ;;  %v121_v4 = vld [vmem:[%s290_s3] ss:$0 sm:$0xff]  ;;  %v73_v34 = vsel %vm44_vm0, 0.25, %v215_v33  ;;  %s111_s2 = sshll.u32 %s216_s1, 4  ;;  %s112_s2 = int_to_ptr.vmem [resolvable:$true] %s111_s2 }
  0x28   :  { %81 = vadd.xlane.f32.xlu0 %v80_v2  ;;  %v53_v5 = vsub.f32 %v42_v3, %v121_v4  ;;  %s185_s3 = scalar_lea.vmem %s112_s2, 16  ;;  %s189_s16 = scalar_lea.vmem %s112_s2, 32 }
  0x29   :  { %p186_p2 = scmp.ne.s32.totalorder %s112_s2, %s185_s3  ;;  %p190_p3 = scmp.lt.s32.totalorder %s112_s2, %s112_s2 }
  0x2a   :  { %v54_v6 = vmul.f32 -2.0, %v53_v5  ;;  %p191_p4 = scmp.lt.s32.totalorder %s189_s16, %s185_s3 }
  0x2c   :  { %v55_v7 = vsel %vm44_vm0, %v53_v5, %v54_v6  ;;  %p192_p5 = por %p191_p4, %p190_p3 }
  0x2d   :  { %v56_v8 = vsub.f32 0.0, %v55_v7 }
  0x2e   :  { %p193_p6 = pnand %p192_p5, %p186_p2 }
  0x2f   :  { %v57_v9 = vmin.f32 %v56_v8, 18.420681 }
  0x31   :  { %v58_v12 = vmul.f32 1.442695, %v57_v9 }
  0xb5   :  { %v82_v10 = vpop.xlane.xlu0 %81 }
  0xb6   :  { %v83_v11 = vmax.f32 %v82_v10, 1e-30 }
  0xb8   :  { %129 = vrcp.f32 %v83_v11 }
  0xb9   :  { %131 = vpow2.f32 %v58_v12 }
  0xc2   :  { %v130_v13 = vpop.eup %129 }
  0xc3   :  { %v85_v14 = vmul.f32 10.0, %v130_v13  ;;  %v132_v16 = vpop.eup %131 }
  0xc4   :  { %v60_v19 = vadd.f32 1.0, %v132_v16  ;;  %v63_v20 = vmul.f32 -0.5, %v132_v16  ;;  %v66_v26 = vand.u32 2147483647, %v132_v16 }
  0xc5   :  { %v86_v15 = vmul.f32 %v122_v1, %v85_v14 }
  0xc6   :  { %v64_v24 = vadd.f32 1.0, %v63_v20  ;;  %vm67_vm1 = vcmp.lt.f32.partialorder %v66_v26, 0.0004427343 }
  0xc7   :  { %v123_v17 = vadd.f32 -2.0, %v86_v15 }
  0xc8   :  { %v65_v29 = vmul.f32 %v132_v16, %v64_v24 }
  0xc9   :  { %v124_v18 = vmul.f32 -1.442695, %v123_v17 }
  0xcb   :  { %133 = vpow2.f32 %v124_v18 }
  0xcc   :  { %135 = vrcp.f32 %v60_v19 }
  0xcd   :  { %137 = vlog2.f32 %v60_v19 }
  0xd5   :  { %v134_v21 = vpop.eup %133 }
  0xd6   :  { %v91_v22 = vadd.f32 1.0, %v134_v21  ;;  %v136_v23 = vpop.eup %135 }
  0xd7   :  { %v138_v25 = vpop.eup %137  ;;  %v71_v27 = vmul.f32 %v136_v23, %v132_v16 }
  0xd8   :  { %139 = vrcp.f32 %v91_v22  ;;  %v62_v28 = vmul.f32 0.6931472, %v138_v25 }
  0xd9   :  { %v72_v30 = vmul.f32 %v71_v27, %v71_v27 }
  0xda   :  { %v68_v31 = vsel %vm67_vm1, %v65_v29, %v62_v28 }
  0xdb   :  { %v95_v36 = vmul.f32 %v72_v30, %v68_v31 }
  0xe2   :  { %v140_v32 = vpop.eup %139 }
  0xe3   :  { %v94_v35 = vadd.f32 0.1, %v140_v32 }
  0xe5   :  { %v96_v37 = vmul.f32 %v94_v35, %v73_v34 }
  0xe7   :  { %v97_v38 = vmul.f32 %v96_v37, %v95_v36 }
  0xe9   :  { %v98_v39 = vrot.slane %v97_v38, 4 }
  0xeb   :  { %v99_v40 = vadd.f32 %v98_v39, %v97_v38 }
  0xed   :  { %v100_v41 = vrot.slane %v99_v40, 2 }
  0xef   :  { %v101_v42 = vadd.f32 %v100_v41, %v99_v40 }
  0xf1   :  { %v102_v43 = vrot.slane %v101_v42, 1 }
  0xf3   :  { %v103_v44 = vadd.f32 %v102_v43, %v101_v42 }
  0xf5   :  { %104 = vst [vmem:[#allocation7] sm:$0x1] %v103_v44 }
  0xf6   :  { %196 = shalt.err (!%p193_p6)
}
  0xf7   :  { %s197_s19 = scalar_lea.hbm %s291_s4, 16 }
  0xf8   :  { %p198_p7 = scmp.ne.s32.totalorder %s291_s4, %s197_s19  ;;  %p201_p8 = scmp.lt.u32.totalorder %s197_s19, %s291_s4 }
  0xfa   :  { %p203_p9 = pnand %p201_p8, %p198_p7 }
  0xfc   :  { %206 = shalt.err (!%p203_p9)
}
  0xfd   :  { %114 = dma.vmem_to_hbm [thread:$0]  %s112_s2, 16, %s291_s4, [#allocation4]  }
  0xfe   :  { %211 = dma.done.wait [#allocation4], 16  }
  0xff   :  { %212 = vsyncadd [#allocation4], 4294967280 }
 0x100   :  { %118 = vsyncpa [#allocation3], 1 }
 0x101   :  { %119 = vsyncpa [#allocation6], 1 }
 0x102   :  { %120 = vsyncpa [#allocation4], 1 }

</bundles_post_ra>
